<compile_context>
chip_gen: v7x
topology: tpu7x:2x2x1
jax: 0.10.0
libtpu: 0.0.40
codegen_flags: <defaults>
</compile_context>

<pallas_src>
import jax
import jax.numpy as jnp
from jax.experimental import pallas as pl
from jax.experimental.pallas import tpu as pltpu


K = 4   # kernel_size
S = 4   # stride
P = 2   # padding

# The whole-unit fusion (deconv crop cancelling conv2 zero-pad on one shared
# non-overlapping patch grid) only holds for kernel_size == stride and padding < kernel.
assert K == S and 0 <= P < K, "fusion requires kernel_size == stride and padding < kernel"


def _round_up(x, m):
    return (x + m - 1) // m * m


def _vmem_capacity_bytes():
    try:
        return int(pltpu.get_tpu_info().vmem_capacity_bytes)
    except Exception:
        return 64 * 1024 * 1024          # v7x-safe fallback


def _pick_tile_m(m, ckk, n_pad, vmem_cap):
    """M-tile sized against the chip's real VMEM: ~vmem/8 per-tile budget
    (16 MiB on v5e/v6e, 8 MiB on v7x), multiples of 256 for the MXU, and capped
    so the 'parallel' grid keeps >= 4 steps (2 per v7x TensorCore)."""
    per_row = (2 * 2 * ckk                    # bf16 patches, double buffered
               + 2 * 2 * 4                    # (tm, 2) int32 patch bases, double buffered
               + 4 * (2 * ckk + 2 * n_pad)    # f32 l0 / h0 / diff / out working set
               + 2 * 4 * n_pad)               # f32 output block, double buffered
    budget = max(vmem_cap // 8, 4 * 1024 * 1024)
    tm = budget // max(per_row, 1)
    tm = min(2048, max(256, tm - tm % 256))
    tm = min(tm, max(256, _round_up(pl.cdiv(m, 4), 256)))   # keep >= ~4 grid steps
    return min(tm, _round_up(m, 8))


# ----------------------------- fused Pallas kernel ---------------------------

def _make_dpu_kernel(c, h_hi, w_hi, dense_out):
    """c: real channel count (weights lane-padded to NP >= c).
    h_hi/w_hi: exclusive upper bounds of the valid (non-border) region in the
    padded (Ho*S, Wo*S) grid, i.e. Ho*S - P and Wo*S - P.
    dense_out: store the full lane-dense (tm, NP) slab instead of (tm, c)."""

    def kernel(border_ref, alpha_ref, a_ref, hw_ref, khkw_ref,
               w1_ref, b1_ref, w2_ref, b2_ref, w3_ref, b3_ref, o_ref):
        a_bf = a_ref[...]                                   # (tm, ckk) bf16
        xf = a_bf.astype(jnp.float32)
        alpha1 = alpha_ref[0]
        alpha2 = alpha_ref[1]
        alpha3 = alpha_ref[2]

        # ---- conv1: l0 = PReLU(patches @ W1 + b1) ------------------- MXU
        l0 = jnp.dot(a_bf, w1_ref[...], preferred_element_type=jnp.float32)
        l0 = l0 + b1_ref[...]
        l0 = jnp.where(l0 >= 0.0, l0, alpha1 * l0)          # (tm, NP); cols >= c are 0

        # ---- deconv: h0 = PReLU(l0 @ W2 + b2) ----------------------- MXU
        # W2 rows >= c are zero and l0 cols >= c are zero, so the padded
        # contraction is exact; no small-C VPU path, no lane sub-slice.
        h0 = jnp.dot(l0.astype(jnp.bfloat16), w2_ref[...],
                     preferred_element_type=jnp.float32) + b2_ref[...]
        h0 = jnp.where(h0 >= 0.0, h0, alpha2 * h0)          # (tm, ckk) f32

        # ---- conv2 + fused residual on a given diff ----------------- MXU
        def tail(diff):
            out = jnp.dot(diff.astype(jnp.bfloat16), w3_ref[...],
                          preferred_element_type=jnp.float32)
            out = out + b3_ref[...]
            out = jnp.where(out >= 0.0, out, alpha3 * out) + l0
            if dense_out:
                o_ref[...] = out                            # lane-dense (tm, NP) store
            else:
                o_ref[...] = out[:, :c]                     # compact (tm, c) store

        is_border = border_ref[pl.program_id(0)]

        @pl.when(is_border == 0)
        def _interior():                                    # no mask work at all
            tail(h0 - xf)

        @pl.when(is_border != 0)
        def _border():
            # Rebuild the deconv-crop / conv2-zero-pad border mask from the
            # per-row patch base and the precomputed per-column (kh, kw) offsets.
            hh = hw_ref[:, 0:1] + khkw_ref[0:1, :]          # (tm,1) + (1,ckk)
            ww = hw_ref[:, 1:2] + khkw_ref[1:2, :]
            valid = (hh >= P) & (hh < h_hi) & (ww >= P) & (ww < w_hi)
            tail(jnp.where(valid, h0 - xf, 0.0))

    return kernel


# ----------------------------- parameter preparation -------------------------

def prepare_params(params):
    """One-time reshape / pad / bf16-cast of the weights into matmul-ready form
    (hoisted out of the forward so it is not redone every step)."""
    C = params["conv1_w"].shape[0]
    CKK = C * K * K
    NP = _round_up(C, 128)          # lane-pad only the tiny weight/bias N dim

    def conv_w(w):                  # OIHW -> (C*K*K, NP) bf16, cols >= C are zero
        wm = jnp.transpose(w, (1, 2, 3, 0)).reshape(CKK, C)
        return jnp.zeros((CKK, NP), jnp.bfloat16).at[:, :C].set(
            wm.astype(jnp.bfloat16))

    def conv_b(b):
        return jnp.zeros((1, NP), jnp.float32).at[0, :C].set(b.astype(jnp.float32))

    # ConvTranspose weight (Cin, Cout, K, K) -> (NP, Cout*K*K); zero rows >= C so
    # the deconv always runs as one MXU matmul against the lane-padded l0.
    w2 = jnp.zeros((NP, CKK), jnp.bfloat16).at[:C, :].set(
        params["deconv_w"].reshape(C, CKK).astype(jnp.bfloat16))

    cols = jnp.arange(CKK, dtype=jnp.int32)       # patch column order = (c, kh, kw)
    return {
        "w1": conv_w(params["conv1_w"]), "b1": conv_b(params["conv1_b"]),
        "w2": w2,
        "b2": jnp.repeat(params["deconv_b"], K * K).reshape(1, CKK).astype(jnp.float32),
        "w3": conv_w(params["conv2_w"]), "b3": conv_b(params["conv2_b"]),
        "alphas": jnp.stack([params["prelu1"], params["prelu2"],
                             params["prelu3"]]).astype(jnp.float32),
        # per-column (kh, kw) offsets, built once (no in-kernel iota / shifts).
        "khkw": jnp.stack([(cols // K) % K, cols % K]),
    }


# ----------------------------- forward pass ----------------------------------

def down_projection_unit(prepped, x):
    """Forward pass of DwonProjectionUnit. x: (N, C, H, W) float32 (NCHW)."""
    N, C, H, W = x.shape
    assert (H + 2 * P) % S == 0 and (W + 2 * P) % S == 0
    Ho, Wo = (H + 2 * P) // S, (W + 2 * P) // S
    M = N * Ho * Wo
    CKK = C * K * K
    NP = prepped["w1"].shape[1]
    h_hi, w_hi = Ho * S - P, Wo * S - P

    # im2col: stride == kernel -> non-overlapping patches -> pure pad/reshape/transpose.
    # Cast to bf16 BEFORE the rearrangement so the XLA fusion reads and writes bf16.
    xp = jnp.pad(x.astype(jnp.bfloat16), ((0, 0), (0, 0), (P, P), (P, P)))
    patches = (xp.reshape(N, C, Ho, S, Wo, S)
                 .transpose(0, 2, 4, 1, 3, 5)
                 .reshape(M, CKK))
    # TODO(synk): fold the im2col itself into the kernel (3-D grid over (n, ho, wo)
    # tiles of NHWC input) to remove this remaining wrapper-side HBM round trip.

    # Per-patch top-left corner in the padded (Ho*S, Wo*S) grid, packed as (M, 2).
    rows = jnp.arange(M, dtype=jnp.int32)
    hb = ((rows // Wo) % Ho) * S
    wb = (rows % Wo) * S
    hw = jnp.stack([hb, wb], axis=1)                         # (M, 2) int32

    vmem_cap = _vmem_capacity_bytes()
    tm = _pick_tile_m(M, CKK, NP, vmem_cap)
    num_tiles = pl.cdiv(M, tm)

    # Per-tile "touches the border" flag (scalar-prefetched): interior tiles skip
    # the whole mask rebuild inside the kernel.
    row_border = ((hb < P) | (hb + K - 1 >= h_hi) |
                  (wb < P) | (wb + K - 1 >= w_hi)).astype(jnp.int32)
    row_border = jnp.pad(row_border, (0, num_tiles * tm - M))
    tile_border = jnp.max(row_border.reshape(num_tiles, tm), axis=1)

    # Lane-dense output slab for wide C; compact store for narrow C (keeps the
    # tiny output's HBM bytes minimal at small channel counts).
    dense_out = (C >= 64) and (C < NP)
    out_cols = NP if dense_out else C

    cost = pl.CostEstimate(
        flops=6 * M * CKK * NP,
        transcendentals=0,
        bytes_accessed=(M * CKK * 2 + M * 2 * 4 + M * out_cols * 4
                        + 2 * CKK * NP * 2 + NP * CKK * 2 + (2 * NP + CKK) * 4))

    out_flat = pl.pallas_call(
        _make_dpu_kernel(C, h_hi, w_hi, dense_out),
        out_shape=jax.ShapeDtypeStruct((M, out_cols), jnp.float32),
        grid_spec=pltpu.PrefetchScalarGridSpec(
            num_scalar_prefetch=2,                           # tile_border, alphas
            grid=(num_tiles,),
            in_specs=[
                pl.BlockSpec((tm, CKK), lambda i, *_: (i, 0)),   # x patches (bf16)
                pl.BlockSpec((tm, 2), lambda i, *_: (i, 0)),     # patch (hb, wb) int32
                pl.BlockSpec((2, CKK), lambda i, *_: (0, 0)),    # per-col (kh, kw) int32
                pl.BlockSpec((CKK, NP), lambda i, *_: (0, 0)),   # conv1 weight (bf16)
                pl.BlockSpec((1, NP), lambda i, *_: (0, 0)),     # conv1 bias  (f32)
                pl.BlockSpec((NP, CKK), lambda i, *_: (0, 0)),   # deconv weight (bf16)
                pl.BlockSpec((1, CKK), lambda i, *_: (0, 0)),    # deconv bias (f32)
                pl.BlockSpec((CKK, NP), lambda i, *_: (0, 0)),   # conv2 weight (bf16)
                pl.BlockSpec((1, NP), lambda i, *_: (0, 0)),     # conv2 bias  (f32)
            ],
            out_specs=pl.BlockSpec((tm, out_cols), lambda i, *_: (i, 0)),
        ),
        compiler_params=pltpu.CompilerParams(
            dimension_semantics=("parallel",),
            vmem_limit_bytes=max(32 * 1024 * 1024,
                                 min(vmem_cap * 3 // 4, 96 * 1024 * 1024))),
        cost_estimate=cost,
    )(tile_border, prepped["alphas"], patches, hw, prepped["khkw"],
      prepped["w1"], prepped["b1"], prepped["w2"], prepped["b2"],
      prepped["w3"], prepped["b3"])

    if dense_out:
        out_flat = out_flat[:, :C]        # drop weight lane-padding (fuses with transpose)
    # col2im for stride==kernel output is just (N, Ho, Wo, C) -> NCHW.
    return out_flat.reshape(N, Ho, Wo, C).transpose(0, 3, 1, 2)


# ----------------------------- init & pure-JAX reference ---------------------

def init_params(key, channels):
    keys = jax.random.split(key, 6)
    fan_in = channels * K * K
    bound = 1.0 / jnp.sqrt(jnp.float32(fan_in))

    def u(k, shape):
        return jax.random.uniform(k, shape, jnp.float32, -bound, bound)

    return {
        "conv1_w": u(keys[0], (channels, channels, K, K)),   # OIHW
        "conv1_b": u(keys[1], (channels,)),
        "deconv_w": u(keys[2], (channels, channels, K, K)),  # IOHW (ConvTranspose)
        "deconv_b": u(keys[3], (channels,)),
        "conv2_w": u(keys[4], (channels, channels, K, K)),   # OIHW
        "conv2_b": u(keys[5], (channels,)),
        "prelu1": jnp.asarray(0.25, jnp.float32),
        "prelu2": jnp.asarray(0.25, jnp.float32),
        "prelu3": jnp.asarray(0.25, jnp.float32),
    }


def reference_forward(params, x):
    def prelu(v, a):
        return jnp.where(v >= 0, v, a * v)

    def conv(v, w, b):
        y = jax.lax.conv_general_dilated(
            v, w, window_strides=(S, S), padding=[(P, P), (P, P)],
            dimension_numbers=("NCHW", "OIHW", "NCHW"))
        return y + b[None, :, None, None]

    def deconv(v, w, b):
        w_f = jnp.flip(w, axis=(2, 3)).transpose(1, 0, 2, 3)  # -> OIHW
        y = jax.lax.conv_general_dilated(
            v, w_f, window_strides=(1, 1),
            padding=[(K - 1 - P, K - 1 - P)] * 2,
            lhs_dilation=(S, S),
            dimension_numbers=("NCHW", "OIHW", "NCHW"))
        return y + b[None, :, None, None]

    l0 = prelu(conv(x, params["conv1_w"], params["conv1_b"]), params["prelu1"])
    h0 = prelu(deconv(l0, params["deconv_w"], params["deconv_b"]), params["prelu2"])
    l1 = prelu(conv(h0 - x, params["conv2_w"], params["conv2_b"]), params["prelu3"])
    return l1 + l0


# ----------------------------------- main ------------------------------------

if __name__ == "__main__":
    key = jax.random.PRNGKey(0)
    k_param, k_x = jax.random.split(key)

    channels = 4
    x = jax.random.normal(k_x, (2, channels, 16, 16), dtype=jnp.float32)
    params = init_params(k_param, channels)
    prepped = prepare_params(params)          # one-time weight prep (outside forward)

    fwd = jax.jit(down_projection_unit)
    out = jax.block_until_ready(fwd(prepped, x))

    ref = jax.block_until_ready(reference_forward(params, x))
    assert out.shape == ref.shape == (2, channels, 5, 5)
    # bf16 MXU inputs vs f32 reference -> looser tolerance than pure f32.
    assert jnp.allclose(out, ref, atol=3e-2, rtol=3e-2), \
        float(jnp.max(jnp.abs(out - ref)))

    print("KERNEL_OK")
</pallas_src>

<mosaic_0001>
module attributes {stable_mosaic.version = 11 : i64} {
  func.func @kernel(%arg0: i32, %arg1: memref<1xi32, #tpu.memory_space<smem>>, %arg2: memref<3xf32, #tpu.memory_space<smem>>, %arg3: memref<56x64xbf16, #tpu.memory_space<vmem>>, %arg4: memref<56x2xi32, #tpu.memory_space<vmem>>, %arg5: memref<2x64xi32, #tpu.memory_space<vmem>>, %arg6: memref<64x128xbf16, #tpu.memory_space<vmem>>, %arg7: memref<1x128xf32, #tpu.memory_space<vmem>>, %arg8: memref<128x64xbf16, #tpu.memory_space<vmem>>, %arg9: memref<1x64xf32, #tpu.memory_space<vmem>>, %arg10: memref<64x128xbf16, #tpu.memory_space<vmem>>, %arg11: memref<1x128xf32, #tpu.memory_space<vmem>>, %arg12: memref<56x4xf32, #tpu.memory_space<vmem>>) attributes {dimension_semantics = [#tpu.dimension_semantics<parallel>], iteration_bounds = array<i64: 1>, scalar_prefetch = 2 : i64, scratch_operands = 0 : i64, tpu.core_type = #tpu.core_type<tc>, window_params = [{transform_indices = @transform_0, window_bounds = array<i64: 56, 64>}, {transform_indices = @transform_1, window_bounds = array<i64: 56, 2>}, {pipeline_mode = #tpu.pipeline_mode<synchronous>, transform_indices = @transform_2, window_bounds = array<i64: 2, 64>}, {pipeline_mode = #tpu.pipeline_mode<synchronous>, transform_indices = @transform_3, window_bounds = array<i64: 64, 128>}, {pipeline_mode = #tpu.pipeline_mode<synchronous>, transform_indices = @transform_4, window_bounds = array<i64: 1, 128>}, {pipeline_mode = #tpu.pipeline_mode<synchronous>, transform_indices = @transform_5, window_bounds = array<i64: 128, 64>}, {pipeline_mode = #tpu.pipeline_mode<synchronous>, transform_indices = @transform_6, window_bounds = array<i64: 1, 64>}, {pipeline_mode = #tpu.pipeline_mode<synchronous>, transform_indices = @transform_7, window_bounds = array<i64: 64, 128>}, {pipeline_mode = #tpu.pipeline_mode<synchronous>, transform_indices = @transform_8, window_bounds = array<i64: 1, 128>}, {transform_indices = @transform_9, window_bounds = array<i64: 56, 4>}]} {
    %c0 = arith.constant 0 : index
    %c0_0 = arith.constant 0 : index
    %0 = vector.load %arg3[%c0, %c0_0] : memref<56x64xbf16, #tpu.memory_space<vmem>>, vector<56x64xbf16>
    %1 = arith.extf %0 : vector<56x64xbf16> to vector<56x64xf32>
    %c0_1 = arith.constant 0 : index
    %2 = memref.load %arg2[%c0_1] : memref<3xf32, #tpu.memory_space<smem>>
    %c1 = arith.constant 1 : index
    %3 = memref.load %arg2[%c1] : memref<3xf32, #tpu.memory_space<smem>>
    %c2 = arith.constant 2 : index
    %4 = memref.load %arg2[%c2] : memref<3xf32, #tpu.memory_space<smem>>
    %c0_2 = arith.constant 0 : index
    %c0_3 = arith.constant 0 : index
    %5 = vector.load %arg6[%c0_2, %c0_3] : memref<64x128xbf16, #tpu.memory_space<vmem>>, vector<64x128xbf16>
    %cst = arith.constant dense<0.000000e+00> : vector<56x128xf32>
    %6 = tpu.matmul %0, %5, %cst {dimension_numbers = #tpu.dot_dimension_numbers<[1], [0], [0], [1], [0, 0, 1, 1], [], []>} : vector<56x64xbf16>, vector<64x128xbf16>, vector<56x128xf32> -> vector<56x128xf32>
    %c0_4 = arith.constant 0 : index
    %c0_5 = arith.constant 0 : index
    %7 = vector.load %arg7[%c0_4, %c0_5] : memref<1x128xf32, #tpu.memory_space<vmem>>, vector<1x128xf32>
    %8 = vector.broadcast %7 : vector<1x128xf32> to vector<56x128xf32>
    %9 = arith.addf %6, %8 : vector<56x128xf32>
    %cst_6 = arith.constant 0.000000e+00 : f32
    %10 = vector.broadcast %cst_6 : f32 to vector<56x128xf32>
    %11 = arith.cmpf oge, %9, %10 : vector<56x128xf32>
    %12 = vector.broadcast %2 : f32 to vector<56x128xf32>
    %13 = arith.mulf %12, %9 : vector<56x128xf32>
    %14 = arith.select %11, %9, %13 : vector<56x128xi1>, vector<56x128xf32>
    %15 = arith.truncf %14 : vector<56x128xf32> to vector<56x128xbf16>
    %c0_7 = arith.constant 0 : index
    %c0_8 = arith.constant 0 : index
    %16 = vector.load %arg8[%c0_7, %c0_8] : memref<128x64xbf16, #tpu.memory_space<vmem>>, vector<128x64xbf16>
    %cst_9 = arith.constant dense<0.000000e+00> : vector<56x64xf32>
    %17 = tpu.matmul %15, %16, %cst_9 {dimension_numbers = #tpu.dot_dimension_numbers<[1], [0], [0], [1], [0, 0, 1, 1], [], []>} : vector<56x128xbf16>, vector<128x64xbf16>, vector<56x64xf32> -> vector<56x64xf32>
    %c0_10 = arith.constant 0 : index
    %c0_11 = arith.constant 0 : index
    %18 = vector.load %arg9[%c0_10, %c0_11] : memref<1x64xf32, #tpu.memory_space<vmem>>, vector<1x64xf32>
    %19 = vector.broadcast %18 : vector<1x64xf32> to vector<56x64xf32>
    %20 = arith.addf %17, %19 : vector<56x64xf32>
    %cst_12 = arith.constant 0.000000e+00 : f32
    %21 = vector.broadcast %cst_12 : f32 to vector<56x64xf32>
    %22 = arith.cmpf oge, %20, %21 : vector<56x64xf32>
    %23 = vector.broadcast %3 : f32 to vector<56x64xf32>
    %24 = arith.mulf %23, %20 : vector<56x64xf32>
    %25 = arith.select %22, %20, %24 : vector<56x64xi1>, vector<56x64xf32>
    %26 = arith.index_cast %arg0 : i32 to index
    %27 = memref.load %arg1[%26] : memref<1xi32, #tpu.memory_space<smem>>
    %c0_i32 = arith.constant 0 : i32
    %28 = arith.cmpi eq, %27, %c0_i32 : i32
    %29 = arith.extui %28 : i1 to i32
    %c0_i32_13 = arith.constant 0 : i32
    %30 = arith.cmpi ne, %29, %c0_i32_13 : i32
    scf.if %30 {
      %34 = arith.subf %25, %1 : vector<56x64xf32>
      %35 = arith.truncf %34 : vector<56x64xf32> to vector<56x64xbf16>
      %c0_16 = arith.constant 0 : index
      %c0_17 = arith.constant 0 : index
      %36 = vector.load %arg10[%c0_16, %c0_17] : memref<64x128xbf16, #tpu.memory_space<vmem>>, vector<64x128xbf16>
      %cst_18 = arith.constant dense<0.000000e+00> : vector<56x128xf32>
      %37 = tpu.matmul %35, %36, %cst_18 {dimension_numbers = #tpu.dot_dimension_numbers<[1], [0], [0], [1], [0, 0, 1, 1], [], []>} : vector<56x64xbf16>, vector<64x128xbf16>, vector<56x128xf32> -> vector<56x128xf32>
      %c0_19 = arith.constant 0 : index
      %c0_20 = arith.constant 0 : index
      %38 = vector.load %arg11[%c0_19, %c0_20] : memref<1x128xf32, #tpu.memory_space<vmem>>, vector<1x128xf32>
      %39 = vector.broadcast %38 : vector<1x128xf32> to vector<56x128xf32>
      %40 = arith.addf %37, %39 : vector<56x128xf32>
      %cst_21 = arith.constant 0.000000e+00 : f32
      %41 = vector.broadcast %cst_21 : f32 to vector<56x128xf32>
      %42 = arith.cmpf oge, %40, %41 : vector<56x128xf32>
      %43 = vector.broadcast %4 : f32 to vector<56x128xf32>
      %44 = arith.mulf %43, %40 : vector<56x128xf32>
      %45 = arith.select %42, %40, %44 : vector<56x128xi1>, vector<56x128xf32>
      %46 = arith.addf %45, %14 : vector<56x128xf32>
      %47 = vector.extract_strided_slice %46 {offsets = [0, 0], sizes = [56, 4], strides = [1, 1]} : vector<56x128xf32> to vector<56x4xf32>
      %c0_22 = arith.constant 0 : index
      %c0_23 = arith.constant 0 : index
      %48 = vector.load %arg12[%c0_22, %c0_23] : memref<56x4xf32, #tpu.memory_space<vmem>>, vector<56x4xf32>
      tpu.vector_store %arg12[%c0_22, %c0_23], %47 {strides = array<i32>} : memref<56x4xf32, #tpu.memory_space<vmem>>, vector<56x4xf32>,
    } else {
    }
    %c0_i32_14 = arith.constant 0 : i32
    %31 = arith.cmpi ne, %27, %c0_i32_14 : i32
    %32 = arith.extui %31 : i1 to i32
    %c0_i32_15 = arith.constant 0 : i32
    %33 = arith.cmpi ne, %32, %c0_i32_15 : i32
    scf.if %33 {
      %c0_16 = arith.constant 0 : index
      %c0_17 = arith.constant 0 : index
      %34 = vector.load %arg4[%c0_16, %c0_17] : memref<56x2xi32, #tpu.memory_space<vmem>>, vector<56x1xi32>
      %c0_18 = arith.constant 0 : index
      %c0_19 = arith.constant 0 : index
      %35 = vector.load %arg5[%c0_18, %c0_19] : memref<2x64xi32, #tpu.memory_space<vmem>>, vector<1x64xi32>
      %36 = vector.broadcast %34 : vector<56x1xi32> to vector<56x64xi32>
      %37 = vector.broadcast %35 : vector<1x64xi32> to vector<56x64xi32>
      %38 = arith.addi %36, %37 : vector<56x64xi32>
      %c0_20 = arith.constant 0 : index
      %c1_21 = arith.constant 1 : index
      %39 = vector.load %arg4[%c0_20, %c1_21] : memref<56x2xi32, #tpu.memory_space<vmem>>, vector<56x1xi32>
      %c1_22 = arith.constant 1 : index
      %c0_23 = arith.constant 0 : index
      %40 = vector.load %arg5[%c1_22, %c0_23] : memref<2x64xi32, #tpu.memory_space<vmem>>, vector<1x64xi32>
      %41 = vector.broadcast %39 : vector<56x1xi32> to vector<56x64xi32>
      %42 = vector.broadcast %40 : vector<1x64xi32> to vector<56x64xi32>
      %43 = arith.addi %41, %42 : vector<56x64xi32>
      %c2_i32 = arith.constant 2 : i32
      %44 = vector.broadcast %c2_i32 : i32 to vector<56x64xi32>
      %45 = arith.cmpi sge, %38, %44 : vector<56x64xi32>
      %c18_i32 = arith.constant 18 : i32
      %46 = vector.broadcast %c18_i32 : i32 to vector<56x64xi32>
      %47 = arith.cmpi slt, %38, %46 : vector<56x64xi32>
      %48 = arith.andi %45, %47 : vector<56x64xi1>
      %c2_i32_24 = arith.constant 2 : i32
      %49 = vector.broadcast %c2_i32_24 : i32 to vector<56x64xi32>
      %50 = arith.cmpi sge, %43, %49 : vector<56x64xi32>
      %51 = arith.andi %48, %50 : vector<56x64xi1>
      %c18_i32_25 = arith.constant 18 : i32
      %52 = vector.broadcast %c18_i32_25 : i32 to vector<56x64xi32>
      %53 = arith.cmpi slt, %43, %52 : vector<56x64xi32>
      %54 = arith.andi %51, %53 : vector<56x64xi1>
      %55 = arith.subf %25, %1 : vector<56x64xf32>
      %cst_26 = arith.constant 0.000000e+00 : f32
      %56 = vector.broadcast %cst_26 : f32 to vector<56x64xf32>
      %57 = arith.select %54, %55, %56 : vector<56x64xi1>, vector<56x64xf32>
      %58 = arith.truncf %57 : vector<56x64xf32> to vector<56x64xbf16>
      %c0_27 = arith.constant 0 : index
      %c0_28 = arith.constant 0 : index
      %59 = vector.load %arg10[%c0_27, %c0_28] : memref<64x128xbf16, #tpu.memory_space<vmem>>, vector<64x128xbf16>
      %cst_29 = arith.constant dense<0.000000e+00> : vector<56x128xf32>
      %60 = tpu.matmul %58, %59, %cst_29 {dimension_numbers = #tpu.dot_dimension_numbers<[1], [0], [0], [1], [0, 0, 1, 1], [], []>} : vector<56x64xbf16>, vector<64x128xbf16>, vector<56x128xf32> -> vector<56x128xf32>
      %c0_30 = arith.constant 0 : index
      %c0_31 = arith.constant 0 : index
      %61 = vector.load %arg11[%c0_30, %c0_31] : memref<1x128xf32, #tpu.memory_space<vmem>>, vector<1x128xf32>
      %62 = vector.broadcast %61 : vector<1x128xf32> to vector<56x128xf32>
      %63 = arith.addf %60, %62 : vector<56x128xf32>
      %cst_32 = arith.constant 0.000000e+00 : f32
      %64 = vector.broadcast %cst_32 : f32 to vector<56x128xf32>
      %65 = arith.cmpf oge, %63, %64 : vector<56x128xf32>
      %66 = vector.broadcast %4 : f32 to vector<56x128xf32>
      %67 = arith.mulf %66, %63 : vector<56x128xf32>
      %68 = arith.select %65, %63, %67 : vector<56x128xi1>, vector<56x128xf32>
      %69 = arith.addf %68, %14 : vector<56x128xf32>
      %70 = vector.extract_strided_slice %69 {offsets = [0, 0], sizes = [56, 4], strides = [1, 1]} : vector<56x128xf32> to vector<56x4xf32>
      %c0_33 = arith.constant 0 : index
      %c0_34 = arith.constant 0 : index
      %71 = vector.load %arg12[%c0_33, %c0_34] : memref<56x4xf32, #tpu.memory_space<vmem>>, vector<56x4xf32>
      tpu.vector_store %arg12[%c0_33, %c0_34], %70 {strides = array<i32>} : memref<56x4xf32, #tpu.memory_space<vmem>>, vector<56x4xf32>,
    } else {
    }
    return
  }
  func.func @transform_0(%arg0: i32, %arg1: memref<1xi32, #tpu.memory_space<smem>>, %arg2: memref<3xf32, #tpu.memory_space<smem>>) -> (i32, i32) {
    %c0_i32 = arith.constant 0 : i32
    %c0_i32_0 = arith.constant 0 : i32
    return %arg0, %c0_i32 : i32, i32
  }
  func.func @transform_1(%arg0: i32, %arg1: memref<1xi32, #tpu.memory_space<smem>>, %arg2: memref<3xf32, #tpu.memory_space<smem>>) -> (i32, i32) {
    %c0_i32 = arith.constant 0 : i32
    %c0_i32_0 = arith.constant 0 : i32
    return %arg0, %c0_i32 : i32, i32
  }
  func.func @transform_2(%arg0: i32, %arg1: memref<1xi32, #tpu.memory_space<smem>>, %arg2: memref<3xf32, #tpu.memory_space<smem>>) -> (i32, i32) {
    %c0_i32 = arith.constant 0 : i32
    %c0_i32_0 = arith.constant 0 : i32
    %c0_i32_1 = arith.constant 0 : i32
    return %c0_i32, %c0_i32_0 : i32, i32
  }
  func.func @transform_3(%arg0: i32, %arg1: memref<1xi32, #tpu.memory_space<smem>>, %arg2: memref<3xf32, #tpu.memory_space<smem>>) -> (i32, i32) {
    %c0_i32 = arith.constant 0 : i32
    %c0_i32_0 = arith.constant 0 : i32
    %c0_i32_1 = arith.constant 0 : i32
    return %c0_i32, %c0_i32_0 : i32, i32
  }
  func.func @transform_4(%arg0: i32, %arg1: memref<1xi32, #tpu.memory_space<smem>>, %arg2: memref<3xf32, #tpu.memory_space<smem>>) -> (i32, i32) {
    %c0_i32 = arith.constant 0 : i32
    %c0_i32_0 = arith.constant 0 : i32
    %c0_i32_1 = arith.constant 0 : i32
    return %c0_i32, %c0_i32_0 : i32, i32
  }
  func.func @transform_5(%arg0: i32, %arg1: memref<1xi32, #tpu.memory_space<smem>>, %arg2: memref<3xf32, #tpu.memory_space<smem>>) -> (i32, i32) {
    %c0_i32 = arith.constant 0 : i32
    %c0_i32_0 = arith.constant 0 : i32
    %c0_i32_1 = arith.constant 0 : i32
    return %c0_i32, %c0_i32_0 : i32, i32
  }
  func.func @transform_6(%arg0: i32, %arg1: memref<1xi32, #tpu.memory_space<smem>>, %arg2: memref<3xf32, #tpu.memory_space<smem>>) -> (i32, i32) {
    %c0_i32 = arith.constant 0 : i32
    %c0_i32_0 = arith.constant 0 : i32
    %c0_i32_1 = arith.constant 0 : i32
    return %c0_i32, %c0_i32_0 : i32, i32
  }
  func.func @transform_7(%arg0: i32, %arg1: memref<1xi32, #tpu.memory_space<smem>>, %arg2: memref<3xf32, #tpu.memory_space<smem>>) -> (i32, i32) {
    %c0_i32 = arith.constant 0 : i32
    %c0_i32_0 = arith.constant 0 : i32
    %c0_i32_1 = arith.constant 0 : i32
    return %c0_i32, %c0_i32_0 : i32, i32
  }
  func.func @transform_8(%arg0: i32, %arg1: memref<1xi32, #tpu.memory_space<smem>>, %arg2: memref<3xf32, #tpu.memory_space<smem>>) -> (i32, i32) {
    %c0_i32 = arith.constant 0 : i32
    %c0_i32_0 = arith.constant 0 : i32
    %c0_i32_1 = arith.constant 0 : i32
    return %c0_i32, %c0_i32_0 : i32, i32
  }
  func.func @transform_9(%arg0: i32, %arg1: memref<1xi32, #tpu.memory_space<smem>>, %arg2: memref<3xf32, #tpu.memory_space<smem>>) -> (i32, i32) {
    %c0_i32 = arith.constant 0 : i32
    %c0_i32_0 = arith.constant 0 : i32
    return %arg0, %c0_i32 : i32, i32
  }
}

</mosaic_0001>

<bundles_post_ra>
// kernel: down_projection_unit.1
= control target key start
LH: loop header
LB: loop body
LE: loop exit
PB: predicated region body
PF: predicated region fallthrough
CT: control target
= control target key end

     0   :  { %s1497_s0 = inlined_call_operand.<no memory space> [shape: s32[1], index: 0, kind: input, shape index: {}]   ;;  %s1498_s1 = inlined_call_operand.vmem [shape: f32[3], index: 1, kind: input, shape index: {}]   ;;  %s1499_s2 = inlined_call_operand.vmem [shape: bf16[50,64], index: 2, kind: input, shape index: {}]   ;;  %s1500_s3 = inlined_call_operand.vmem [shape: s32[50,2], index: 3, kind: input, shape index: {}]   ;;  %s1501_s4 = inlined_call_operand.vmem [shape: s32[2,64], index: 4, kind: input, shape index: {}]   ;;  %s1502_s5 = inlined_call_operand.vmem [shape: bf16[64,128], index: 5, kind: input, shape index: {}]   ;;  %s1503_s6 = inlined_call_operand.vmem [shape: f32[1,128], index: 6, kind: input, shape index: {}]   ;;  %s1504_s7 = inlined_call_operand.vmem [shape: bf16[128,64], index: 7, kind: input, shape index: {}]   ;;  %s1505_s8 = inlined_call_operand.vmem [shape: f32[1,64], index: 8, kind: input, shape index: {}]   ;;  %s1506_s9 = inlined_call_operand.vmem [shape: bf16[64,128], index: 9, kind: input, shape index: {}]   ;;  %s1507_s10 = inlined_call_operand.vmem [shape: f32[1,128], index: 10, kind: input, shape index: {}]   ;;  %s1508_s11 = inlined_call_operand.vmem [shape: f32[50,4], index: 11, kind: output, shape index: {}]  }
   0x1   :  { %s17_s19 = sshll.u32 %s1498_s1, 4  ;;  %s18_s19 = int_to_ptr.vmem [resolvable:$true] %s17_s19 }
   0x2   :  { %s1048_s20 = scalar_lea.vmem %s18_s19, 16  ;;  %p1053_p1 = scmp.lt.s32.totalorder %s18_s19, %s18_s19 }
   0x3   :  { %p1049_p0 = scmp.ne.s32.totalorder %s18_s19, %s1048_s20  ;;  %p1054_p2 = scmp.lt.s32.totalorder %s1048_s20, %s1048_s20 }
   0x5   :  { %p1055_p3 = por %p1054_p2, %p1053_p1 }
   0x7   :  { %p1056_p4 = pnand %p1055_p3, %p1049_p0 }
   0x9   :  { %1059 = shalt.err (!%p1056_p4)  }
   0xa   :  { %s1062_s21 = smov [#allocation4]  }
   0xb   :  { %20 = dma.vmem_to_smem %s18_s19, 16, %s1062_s21, [#allocation2] }
   0xc   :  { %1060 = dma.done.wait [#allocation2], 16 }
   0xd   :  { %1061 = vsyncadd [#allocation2], 4294967280 }
   0xe   :  { %22 = sfence }
   0xf   :  { %s1128_s22 = sld [smem:[#allocation4 + $0x2]]  ;;  %v1017_v0 = vld [vmem:[%s1502_s5] sm:$0xff]   ;;  %v1018_v1 = vld [vmem:[%s1502_s5 + $0x8] sm:$0xff]   ;;  %v1019_v2 = vld [vmem:[%s1502_s5 + $0x10] sm:$0xff]   ;;  %vm1509_vm0 = vcmask 523264   ;;  %s56_s14 = sld [smem:[#allocation4]] }
  0x10   :  { %926 = vmatprep.subr.bf16.mxu0 %v1017_v0  ;;  %v1142_v3 = vld [vmem:[%s1499_s2] sm:$0xff]   ;;  %v1147_v4 = vld [vmem:[%s1499_s2 + $0x8] sm:$0xff]   ;;  %v1155_v8 = vld [vmem:[%s1499_s2 + $0x10] sm:$0xff]   ;;  %p868_p5 = scmp.ne.s32.totalorder %s1497_s0, 0 }
  0x11   :  { %927 = vmatpush3.bf16.msra.mxu0 %v1017_v0  ;;  %v49_v5 = vunpack.c.l.bf16 %v1142_v3  ;;  %v50_v6 = vunpack.c.h.bf16 %v1142_v3  ;;  %v51_v7 = vunpack.c.l.bf16 %v1147_v4  ;;  %v1160_v9 = vld [vmem:[%s1499_s2 + $0x18] sm:$0xf]  ;;  %v52_v10 = vunpack.c.h.bf16 %v1147_v4  ;;  %v1025_v13 = vld [vmem:[%s1504_s7] sm:$0xff]   ;;  %934 = vmatprep.mubr.msk.bf16.mxu0 %vm1509_vm0, %v1142_v3  ;;  %v1026_v15 = vld [vmem:[%s1504_s7 + $0x8] sm:$0xff]  }
  0x12   :  { %928 = vmatprep.subr.bf16.mxu0 %v1018_v1  ;;  %v53_v11 = vunpack.c.l.bf16 %v1155_v8  ;;  %v54_v12 = vunpack.c.h.bf16 %v1155_v8  ;;  %v55_v14 = vunpack.c.l.bf16 %v1160_v9  ;;  %942 = vmatprep.subr.bf16.mxu1 %v1025_v13  ;;  %v1020_v16 = vld [vmem:[%s1502_s5 + $0x18] sm:$0xff]   ;;  %v1027_v17 = vld [vmem:[%s1504_s7 + $0x10] sm:$0xff]   ;;  %v1029_v19 = vld [vmem:[%s1504_s7 + $0x20] sm:$0xff]   ;;  %v850_v20 = vcombine.low %v1160_v9, %v1160_v9 }
  0x13   :  { %943 = vmatpush3.bf16.msra.mxu1 %v1025_v13  ;;  %v1028_v18 = vld [vmem:[%s1504_s7 + $0x18] sm:$0xff]   ;;  %v1030_v21 = vld [vmem:[%s1504_s7 + $0x28] sm:$0xff]   ;;  %v1031_v22 = vld [vmem:[%s1504_s7 + $0x30] sm:$0xff]   ;;  %vm536_vm15 = vcmask (!%p868_p5), 31744  }
  0x14   :  { %944 = vmatprep.subr.bf16.mxu1 %v1026_v15  ;;  %v1032_v23 = vld [vmem:[%s1504_s7 + $0x38] sm:$0xff]   ;;  %v846_v24 = vld [vmem:[%s1503_s6] ss:$0 sm:$0xff]  ;;  %s844_s6 = sld [smem:[#allocation4 + $0x1]] }
  0x15   :  { %929 = vmatpush3.bf16.msra.mxu0 %v1018_v1  ;;  %v200_v26 = vstv %s56_s14  ;;  %v859_v59 = vld [vmem:[%s1505_s8] ss:$0 sm:$0xff] }
  0x16   :  { %930 = vmatprep.subr.bf16.mxu0 %v1019_v2 }
  0x17   :  { %945 = vmatpush3.bf16.msra.mxu1 %v1026_v15 }
  0x18   :  { %946 = vmatprep.subr.bf16.mxu1 %v1027_v17 }
  0x19   :  { %931 = vmatpush3.bf16.msra.mxu0 %v1019_v2 }
  0x1a   :  { %932 = vmatprep.subr.bf16.mxu0 %v1020_v16  ;;  %v361_v61 = vstv %s844_s6 }
  0x1b   :  { %947 = vmatpush3.bf16.msra.mxu1 %v1027_v17 }
  0x1c   :  { %948 = vmatprep.subr.bf16.mxu1 %v1028_v18 }
  0x1d   :  { %933 = vmatpush3.bf16.msra.mxu0 %v1020_v16 }
  0x1f   :  { %949 = vmatpush3.bf16.msra.mxu1 %v1028_v18 }
  0x20   :  { %935 = vmatmul.mubr.msk.bf16.vlgmr.msra.gmra.mrb[0].mxu0 %vm1509_vm0, %v1147_v4  ;;  %950 = vmatprep.subr.bf16.mxu1 %v1029_v19 }
  0x21   :  { %938 = vmatprep.mubr.msk.bf16.mxu0 %vm1509_vm0, %v1155_v8 }
  0x23   :  { %951 = vmatpush3.bf16.msra.mxu1 %v1029_v19 }
  0x24   :  { %952 = vmatprep.subr.bf16.mxu1 %v1030_v21 }
  0x27   :  { %953 = vmatpush3.bf16.msra.mxu1 %v1030_v21 }
  0x28   :  { %939 = vmatmul.mubr.msk.bf16.gmra.mrb[4].mxu0 %vm1509_vm0, %v850_v20  ;;  %954 = vmatprep.subr.bf16.mxu1 %v1031_v22 }
  0x2b   :  { %955 = vmatpush3.bf16.msra.mxu1 %v1031_v22 }
  0x2c   :  { %956 = vmatprep.subr.bf16.mxu1 %v1032_v23 }
  0x2f   :  { %957 = vmatpush3.bf16.msra.mxu1 %v1032_v23 }
  0xf3   :  { %v936_v25 = vpop.f32.mrb[0].mxu0 }
  0xf4   :  { %v172_v27 = vadd.f32 %v936_v25, %v846_v24  ;;  %v163_v28 = vpop.f32.mrb[1].mxu0 }
  0xf5   :  { %v164_v29 = vadd.f32 %v846_v24, %v163_v28  ;;  %v937_v30 = vpop.f32.mrb[2].mxu0 }
  0xf6   :  { %v203_v31 = vmul.f32 %v200_v26, %v172_v27  ;;  %v175_v32 = vadd.f32 %v937_v30, %v846_v24  ;;  %v166_v33 = vpop.f32.mrb[3].mxu0  ;;  %vm195_vm1 = vcmp.ge.f32.partialorder %v172_v27, 0.0 }
  0xf7   :  { %v201_v34 = vmul.f32 %v200_v26, %v164_v29  ;;  %v167_v35 = vadd.f32 %v846_v24, %v166_v33  ;;  %vm193_vm3 = vcmp.ge.f32.partialorder %v164_v29, 0.0 }
  0xf8   :  { %vm196_vm2 = vcmp.ge.f32.partialorder %v175_v32, 0.0  ;;  %v204_v36 = vmul.f32 %v200_v26, %v175_v32  ;;  %v1205_v38 = vsel %vm195_vm1, %v172_v27, %v203_v31 }
  0xf9   :  { %v202_v37 = vmul.f32 %v200_v26, %v167_v35  ;;  %vm194_vm4 = vcmp.ge.f32.partialorder %v167_v35, 0.0  ;;  %v1209_v41 = vsel %vm193_vm3, %v164_v29, %v201_v34 }
  0xfa   :  { %v1207_v39 = vsel %vm196_vm2, %v175_v32, %v204_v36 }
  0xfb   :  { %v940_v40 = vpop.f32.mrb[4].mxu0  ;;  %v1211_v42 = vsel %vm194_vm4, %v167_v35, %v202_v37  ;;  %v216_v43 = vpack.c.bf16 %v1207_v39, %v1205_v38  ;;  %v1036_v37 = vld [vmem:[%s1506_s9] sm:$0xff] (!%p868_p5)  }
  0xfc   :  { %v188_v44 = vadd.f32 %v940_v40, %v846_v24  ;;  %v179_v45 = vpop.f32.mrb[5].mxu0  ;;  %v215_v46 = vpack.c.bf16 %v1211_v42, %v1209_v41  ;;  %966 = vmatprep.subr.bf16.mxu0 (!%p868_p5), %v1036_v37  ;;  %998 = vmatprep.subr.bf16.mxu1 (!%p868_p5), %v1036_v37 }
  0xfd   :  { %v180_v47 = vadd.f32 %v846_v24, %v179_v45  ;;  %v941_v48 = vpop.f32.mrb[6].mxu0  ;;  %967 = vmatpush3.bf16.msra.mxu0 (!%p868_p5), %v1036_v37 }
  0xfe   :  { %v207_v49 = vmul.f32 %v200_v26, %v188_v44  ;;  %v182_v50 = vpop.f32.mrb[7].mxu0  ;;  %958 = vmatprep.mubr.bf16.mxu1 %v215_v46  ;;  %vm199_vm5 = vcmp.ge.f32.partialorder %v188_v44, 0.0  ;;  %v1037_v46 = vld [vmem:[%s1506_s9 + $0x8] sm:$0xff] (!%p868_p5)  }
  0xff   :  { %v205_v51 = vmul.f32 %v200_v26, %v180_v47  ;;  %v183_v52 = vadd.f32 %v846_v24, %v182_v50  ;;  %959 = vmatmul.mubr.bf16.vlgmr.msra.gmra.mrb[0].mxu1 %v216_v43  ;;  %vm197_vm6 = vcmp.ge.f32.partialorder %v180_v47, 0.0  ;;  %968 = vmatprep.subr.bf16.mxu0 (!%p868_p5), %v1037_v46  ;;  %v1039_v50 = vld [vmem:[%s1506_s9 + $0x18] sm:$0xff] (!%p868_p5)  }
 0x100   :  { %v1217_v54 = vsel %vm199_vm5, %v188_v44, %v207_v49  ;;  %1002 = vmatpush3.bf16.msra.mxu1 (!%p868_p5), %v1036_v37  ;;  %v1038_v49 = vld [vmem:[%s1506_s9 + $0x10] sm:$0xff] (!%p868_p5)  }
 0x101   :  { %vm198_vm7 = vcmp.ge.f32.partialorder %v183_v52, 0.0  ;;  %v206_v53 = vmul.f32 %v200_v26, %v183_v52  ;;  %v1219_v55 = vsel %vm197_vm6, %v180_v47, %v205_v51  ;;  %v218_v58 = vpack.c.bf16 %v1217_v54, %v1217_v54  ;;  %999 = vmatprep.subr.bf16.mxu1 (!%p868_p5), %v1037_v46  ;;  %969 = vmatpush3.bf16.msra.mxu0 (!%p868_p5), %v1037_v46 }
 0x102   :  { %970 = vmatprep.subr.bf16.mxu0 (!%p868_p5), %v1038_v49 }
 0x103   :  { %v1221_v56 = vsel %vm198_vm7, %v183_v52, %v206_v53 }
 0x104   :  { %v217_v57 = vpack.c.bf16 %v1221_v56, %v1219_v55  ;;  %1003 = vmatpush3.bf16.msra.mxu1 (!%p868_p5), %v1037_v46 }
 0x105   :  { %1000 = vmatprep.subr.bf16.mxu1 (!%p868_p5), %v1038_v49  ;;  %971 = vmatpush3.bf16.msra.mxu0 (!%p868_p5), %v1038_v49 }
 0x106   :  { %962 = vmatprep.mubr.bf16.mxu1 %v217_v57  ;;  %972 = vmatprep.subr.bf16.mxu0 (!%p868_p5), %v1039_v50 }
 0x107   :  { %963 = vmatmul.mubr.bf16.gmra.mrb[4].mxu1 %v218_v58 }
 0x108   :  { %1004 = vmatpush3.bf16.msra.mxu1 (!%p868_p5), %v1038_v49 }
 0x109   :  { %1001 = vmatprep.subr.bf16.mxu1 (!%p868_p5), %v1039_v50  ;;  %973 = vmatpush3.bf16.msra.mxu0 (!%p868_p5), %v1039_v50 }
 0x10c   :  { %1005 = vmatpush3.bf16.msra.mxu1 (!%p868_p5), %v1039_v50 }
 0x1d2   :  { %v960_v60 = vpop.f32.mrb[0].mxu1 }
 0x1d3   :  { %v333_v62 = vadd.f32 %v960_v60, %v859_v59  ;;  %v324_v63 = vpop.f32.mrb[1].mxu1 }
 0x1d4   :  { %v325_v0 = vadd.f32 %v859_v59, %v324_v63  ;;  %v961_v1 = vpop.f32.mrb[2].mxu1 }
 0x1d5   :  { %vm356_vm8 = vcmp.ge.f32.partialorder %v333_v62, 0.0  ;;  %v364_v2 = vmul.f32 %v361_v61, %v333_v62  ;;  %v336_v13 = vadd.f32 %v961_v1, %v859_v59  ;;  %v327_v15 = vpop.f32.mrb[3].mxu1 }
 0x1d6   :  { %vm354_vm9 = vcmp.ge.f32.partialorder %v325_v0, 0.0  ;;  %v362_v16 = vmul.f32 %v361_v61, %v325_v0  ;;  %v328_v17 = vadd.f32 %v859_v59, %v327_v15 }
 0x1d7   :  { %v1230_v18 = vsel %vm356_vm8, %v333_v62, %v364_v2  ;;  %vm357_vm10 = vcmp.ge.f32.partialorder %v336_v13, 0.0  ;;  %v365_v19 = vmul.f32 %v361_v61, %v336_v13 }
 0x1d8   :  { %v1232_v20 = vsel %vm354_vm9, %v325_v0, %v362_v16  ;;  %vm355_vm11 = vcmp.ge.f32.partialorder %v328_v17, 0.0  ;;  %v363_v21 = vmul.f32 %v361_v61, %v328_v17  ;;  %v383_v51 = vsub.f32 (!%p868_p5), %v1230_v18, %v51_v7 }
 0x1d9   :  { %v1234_v22 = vsel %vm357_vm10, %v336_v13, %v365_v19  ;;  %v381_v40 = vsub.f32 (!%p868_p5), %v1232_v20, %v49_v5 }
 0x1da   :  { %v1236_v23 = vsel %vm355_vm11, %v328_v17, %v363_v21  ;;  %v964_v24 = vpop.f32.mrb[4].mxu1  ;;  %v384_v52 = vsub.f32 (!%p868_p5), %v1234_v22, %v52_v10 }
 0x1db   :  { %v349_v25 = vadd.f32 %v964_v24, %v859_v59  ;;  %v340_v26 = vpop.f32.mrb[5].mxu1  ;;  %v382_v43 = vsub.f32 (!%p868_p5), %v1236_v23, %v50_v6 }
 0x1dc   :  { %v341_v27 = vadd.f32 %v859_v59, %v340_v26  ;;  %v965_v28 = vpop.f32.mrb[6].mxu1  ;;  %380 = sbr.rel (%p868_p5) target bundleno = 711 (0x2c7), region = 41  ;;  %v389_v57 = vpack.c.bf16 (!%p868_p5), %v384_v52, %v383_v51 }
 0x1dd   :  { %vm360_vm12 = vcmp.ge.f32.partialorder %v349_v25, 0.0  ;;  %v368_v29 = vmul.f32 %v361_v61, %v349_v25  ;;  %v343_v30 = vpop.f32.mrb[7].mxu1  ;;  %v388_v47 = vpack.c.bf16 (!%p868_p5), %v382_v43, %v381_v40 }
 0x1de   :  { %vm358_vm13 = vcmp.ge.f32.partialorder %v341_v27, 0.0  ;;  %v366_v31 = vmul.f32 %v361_v61, %v341_v27  ;;  %v344_v32 = vadd.f32 %v859_v59, %v343_v30  ;;  %v869_v59 = vld [vmem:[%s1507_s10] ss:$0 sm:$0xff] (!%p868_p5) }
 0x1df   :  { %v1238_v33 = vsel %vm360_vm12, %v349_v25, %v368_v29  ;;  %974 = vmatprep.mubr.msk.bf16.mxu0 (!%p868_p5), %vm1509_vm0, %v388_v47 }
 0x1e0   :  { %v1240_v34 = vsel %vm358_vm13, %v341_v27, %v366_v31  ;;  %vm359_vm14 = vcmp.ge.f32.partialorder %v344_v32, 0.0  ;;  %v367_v35 = vmul.f32 %v361_v61, %v344_v32  ;;  %v387_v53 = vsub.f32 (!%p868_p5), %v1238_v33, %v55_v14  ;;  %975 = vmatmul.mubr.msk.bf16.vlgmr.msra.gmra.mrb[0].mxu0 (!%p868_p5), %vm1509_vm0, %v389_v57 }
 0x1e1   :  { %v385_v44 = vsub.f32 (!%p868_p5), %v1240_v34, %v53_v11  ;;  %v514_v61 = vstv (!%p868_p5), %s1128_s22 }
 0x1e2   :  { %v1242_v36 = vsel %vm359_vm14, %v344_v32, %v367_v35  ;;  %v391_v58 = vpack.c.bf16 (!%p868_p5), %v387_v53, %v387_v53 }
 0x1e3   :  { %v386_v45 = vsub.f32 %v1242_v36, %v54_v12 }
 0x1e5   :  { %v390_v48 = vpack.c.bf16 %v386_v45, %v385_v44 }
 0x1e7   :  { %978 = vmatprep.mubr.msk.bf16.mxu1 %vm1509_vm0, %v390_v48 }
 0x1e8   :  { %979 = vmatmul.mubr.msk.bf16.vlgmr.msra.gmra.mrb[0].mxu1 %vm1509_vm0, %v391_v58 }
 0x2b3   :  { %v976_v60 = vpop.f32.mrb[0].mxu0 }
 0x2b4   :  { %v486_v63 = vadd.f32 %v976_v60, %v869_v59  ;;  %v477_v1 = vpop.f32.mrb[1].mxu0 }
 0x2b5   :  { %v478_v13 = vadd.f32 %v869_v59, %v477_v1  ;;  %v977_v16 = vpop.f32.mrb[2].mxu0 }
 0x2b6   :  { %vm509_vm1 = vcmp.ge.f32.partialorder %v486_v63, 0.0  ;;  %v517_v19 = vmul.f32 %v514_v61, %v486_v63  ;;  %v480_v24 = vpop.f32.mrb[3].mxu0  ;;  %v489_v30 = vadd.f32 %v977_v16, %v869_v59 }
 0x2b7   :  { %vm507_vm3 = vcmp.ge.f32.partialorder %v478_v13, 0.0  ;;  %v515_v26 = vmul.f32 %v514_v61, %v478_v13  ;;  %v481_v31 = vadd.f32 %v869_v59, %v480_v24 }
 0x2b8   :  { %v524_v28 = vsel %vm509_vm1, %v486_v63, %v517_v19  ;;  %vm510_vm5 = vcmp.ge.f32.partialorder %v489_v30, 0.0  ;;  %v518_v45 = vmul.f32 %v514_v61, %v489_v30 }
 0x2b9   :  { %v531_v32 = vadd.f32 %v524_v28, %v1205_v38  ;;  %v522_v37 = vsel %vm507_vm3, %v478_v13, %v515_v26  ;;  %vm508_vm6 = vcmp.ge.f32.partialorder %v481_v31, 0.0  ;;  %v516_v46 = vmul.f32 %v514_v61, %v481_v31 }
 0x2ba   :  { %v529_v43 = vadd.f32 %v522_v37, %v1209_v41  ;;  %v525_v48 = vsel %vm510_vm5, %v489_v30, %v518_v45 }
 0x2bb   :  { %v980_v62 = vpop.f32.mrb[0].mxu1  ;;  %539 = vst.msk [vmem:[%s1508_s11 + $0x10] sm:$0xff] %vm536_vm15, %v531_v32  ;;  %v532_v49 = vadd.f32 %v525_v48, %v1207_v39  ;;  %v523_v50 = vsel %vm508_vm6, %v481_v31, %v516_v46 }
 0x2bc   :  { %v502_v0 = vadd.f32 %v980_v62, %v869_v59  ;;  %v493_v2 = vpop.f32.mrb[1].mxu1  ;;  %537 = vst.msk [vmem:[%s1508_s11] sm:$0xff] %vm536_vm15, %v529_v43  ;;  %v530_v52 = vadd.f32 %v523_v50, %v1211_v42 }
 0x2bd   :  { %v494_v15 = vadd.f32 %v869_v59, %v493_v2  ;;  %v981_v17 = vpop.f32.mrb[2].mxu1  ;;  %540 = vst.msk [vmem:[%s1508_s11 + $0x18] sm:$0xff] %vm536_vm15, %v532_v49 }
 0x2be   :  { %vm513_vm2 = vcmp.ge.f32.partialorder %v502_v0, 0.0  ;;  %v521_v21 = vmul.f32 %v514_v61, %v502_v0  ;;  %v496_v25 = vpop.f32.mrb[3].mxu1  ;;  %538 = vst.msk [vmem:[%s1508_s11 + $0x8] sm:$0xff] %vm536_vm15, %v530_v52 }
 0x2bf   :  { %vm511_vm4 = vcmp.ge.f32.partialorder %v494_v15, 0.0  ;;  %v519_v27 = vmul.f32 %v514_v61, %v494_v15  ;;  %v497_v47 = vadd.f32 %v869_v59, %v496_v25 }
 0x2c0   :  { %v528_v29 = vsel %vm513_vm2, %v502_v0, %v521_v21 }
 0x2c1   :  { %v535_v35 = vadd.f32 %v528_v29, %v1217_v54  ;;  %v526_v40 = vsel %vm511_vm4, %v494_v15, %v519_v27  ;;  %vm512_vm7 = vcmp.ge.f32.partialorder %v497_v47, 0.0  ;;  %v520_v51 = vmul.f32 %v514_v61, %v497_v47 }
 0x2c2   :  { %v533_v44 = vadd.f32 %v526_v40, %v1219_v55 }
 0x2c3   :  { %543 = vst.msk [vmem:[%s1508_s11 + $0x30] sm:$0xff] %vm536_vm15, %v535_v35  ;;  %v527_v53 = vsel %vm512_vm7, %v497_v47, %v520_v51 }
 0x2c4   :  { %541 = vst.msk [vmem:[%s1508_s11 + $0x20] sm:$0xff] %vm536_vm15, %v533_v44  ;;  %v534_v57 = vadd.f32 %v527_v53, %v1221_v56 }
 0x2c6   :  { %542 = vst.msk [vmem:[%s1508_s11 + $0x28] sm:$0xff] %vm536_vm15, %v534_v57 }
 0x2c7 PF:  { %p878_p6 = scmp.eq.s32.totalorder %s1497_s0, 0 }
 0x2c8   :  { %v552_v58 = vld [vmem:[%s1500_s3 + $0x20] sm:$0xff] (!%p878_p6)  ;;  %v1063_v60 = vmov (!%p878_p6), 0   ;;  %v553_v61 = vld [vmem:[%s1500_s3 + $0x28] sm:$0xff] (!%p878_p6)  ;;  %v551_v63 = vld [vmem:[%s1500_s3 + $0x18] sm:$0xff] (!%p878_p6)  ;;  %v1064_v2 = vmov (!%p878_p6), 1   ;;  %v1510_v46 = vmov (!%p878_p6), 0  ;;  %v676_v8 = vsub.f32 (!%p878_p6), %v1238_v33, %v55_v14 }
 0x2c9   :  { %547 = sbr.rel (%p878_p6) target bundleno = 1102 (0x44e), region = 45  ;;  %v548_v59 = vld [vmem:[%s1500_s3] sm:$0xff] (!%p878_p6)  ;;  %1041 = vset.pattern.permute.xlu1 (!%p878_p6), %v1063_v60  ;;  %1040 = vset.pattern.permute.xlu0 (!%p878_p6), %v1063_v60  ;;  %v549_v62 = vld [vmem:[%s1500_s3 + $0x8] sm:$0xff] (!%p878_p6)  ;;  %v550_v0 = vld [vmem:[%s1500_s3 + $0x10] sm:$0xff] (!%p878_p6)  ;;  %v1513_v50 = vmov (!%p878_p6), 0  ;;  %v1517_v57 = vmov (!%p878_p6), 0 }
 0x2ca   :  { %569 = vperm.xlu1 (!%p878_p6), %1041, %v552_v58   ;;  %557 = vperm.xlu0 (!%p878_p6), %1040, %v548_v59   ;;  %v554_v1 = vld [vmem:[%s1500_s3 + $0x30] sm:$0xff] (!%p878_p6)  ;;  %v1044_v13 = vld [vmem:[%s1506_s9] sm:$0xff] (!%p878_p6)   ;;  %v1045_v15 = vld [vmem:[%s1506_s9 + $0x8] sm:$0xff] (!%p878_p6)  }
 0x2cb   :  { %982 = vmatprep.subr.bf16.mxu0 (!%p878_p6), %v1044_v13  ;;  %1006 = vmatprep.subr.bf16.mxu1 (!%p878_p6), %v1044_v13  ;;  %v1046_v16 = vld [vmem:[%s1506_s9 + $0x10] sm:$0xff] (!%p878_p6)   ;;  %v1047_v17 = vld [vmem:[%s1506_s9 + $0x18] sm:$0xff] (!%p878_p6)   ;;  %v879_v26 = vld [vmem:[%s1501_s4] ss:$0 sm:$0xff] (!%p878_p6) }
 0x2cc   :  { %983 = vmatpush3.bf16.msra.mxu0 (!%p878_p6), %v1044_v13  ;;  %1010 = vmatpush3.bf16.msra.mxu1 (!%p878_p6), %v1044_v13  ;;  %v1365_v35 = vld [vmem:[%s1501_s4 + $0x1] ss:$0 sm:$0xff] (!%p878_p6)  ;;  %v881_v14 = vld [vmem:[%s1507_s10] ss:$0 sm:$0xff] (!%p878_p6) }
 0x2cd   :  { %984 = vmatprep.subr.bf16.mxu0 (!%p878_p6), %v1045_v15  ;;  %1007 = vmatprep.subr.bf16.mxu1 (!%p878_p6), %v1045_v15 }
 0x2ce   :  { %572 = vperm.xlu1 (!%p878_p6), %1041, %v553_v61   ;;  %560 = vperm.xlu0 (!%p878_p6), %1040, %v549_v62  }
 0x2d0   :  { %985 = vmatpush3.bf16.msra.mxu0 %v1045_v15  ;;  %1011 = vmatpush3.bf16.msra.mxu1 %v1045_v15  ;;  %v674_v15 = vsub.f32 %v1240_v34, %v53_v11  ;;  %v673_v11 = vsub.f32 %v1234_v22, %v52_v10 }
 0x2d1   :  { %986 = vmatprep.subr.bf16.mxu0 %v1046_v16  ;;  %1008 = vmatprep.subr.bf16.mxu1 %v1046_v16 }
 0x2d2   :  { %566 = vperm.xlu1 %1041, %v551_v63   ;;  %563 = vperm.xlu0 %1040, %v550_v0  }
 0x2d4   :  { %987 = vmatpush3.bf16.msra.mxu0 %v1046_v16  ;;  %1012 = vmatpush3.bf16.msra.mxu1 %v1046_v16  ;;  %v675_v16 = vsub.f32 %v1242_v36, %v54_v12  ;;  %v810_v36 = vstv %s1128_s22 }
 0x2d5   :  { %988 = vmatprep.subr.bf16.mxu0 %v1047_v17  ;;  %1009 = vmatprep.subr.bf16.mxu1 %v1047_v17 }
 0x2d6   :  { %1042 = vset.pattern.permute.xlu1 %v1064_v2  ;;  %575 = vperm.xlu0 %1040, %v554_v1  }
 0x2d7   :  { %590 = vperm.xlu1 %1042, %v548_v59   ;;  %v1519_v59 = vmov 0 }
 0x2d8   :  { %989 = vmatpush3.bf16.msra.mxu0 %v1047_v17  ;;  %1013 = vmatpush3.bf16.msra.mxu1 %v1047_v17 }
 0x2da   :  { %1043 = vset.pattern.permute.xlu0 %v1064_v2 }
 0x2db   :  { %602 = vperm.xlu1 %1042, %v552_v58   ;;  %593 = vperm.xlu0 %1043, %v549_v62   ;;  %v671_v58 = vsub.f32 %v1236_v23, %v50_v6 }
 0x2df   :  { %605 = vperm.xlu1 %1042, %v553_v61   ;;  %596 = vperm.xlu0 %1043, %v550_v0   ;;  %v670_v61 = vsub.f32 %v1232_v20, %v49_v5 }
 0x2e3   :  { %599 = vperm.xlu1 %1042, %v551_v63   ;;  %608 = vperm.xlu0 %1043, %v554_v1  }
 0x349   :  { %v570_v19 = vpop.permute.xlu1 %569  ;;  %v558_v21 = vpop.permute.xlu0 %557 }
 0x34a   :  { %v585_v27 = vadd.s32 %v879_v26, %v570_v19  ;;  %v581_v30 = vadd.s32 %v879_v26, %v558_v21 }
 0x34c   :  { %vm625_vm8 = vcmp.ge.s32.totalorder %v585_v27, 2  ;;  %vm632_vm9 = vcmp.lt.s32.totalorder %v585_v27, 18  ;;  %vm621_vm10 = vcmp.ge.s32.totalorder %v581_v30, 2  ;;  %vm628_vm11 = vcmp.lt.s32.totalorder %v581_v30, 18 }
 0x34d   :  { %v573_v24 = vpop.permute.xlu1 %572  ;;  %v561_v25 = vpop.permute.xlu0 %560  ;;  %vm1368_vm13 = vmand %vm625_vm8, %vm632_vm9 }
 0x34e   :  { %v586_v31 = vadd.s32 %v879_v26, %v573_v24  ;;  %v582_v32 = vadd.s32 %v879_v26, %v561_v25  ;;  %v1511_v46 = vsel %vm1368_vm13, 4294967295, %v1510_v46  ;;  %vm635_vm2 = vmand %vm621_vm10, %vm628_vm11  ;;  %v672_v24 = vsub.f32 %v1230_v18, %v51_v7 }
 0x350   :  { %vm633_vm14 = vcmp.lt.s32.totalorder %v586_v31, 18  ;;  %vm622_vm15 = vcmp.ge.s32.totalorder %v582_v32, 2  ;;  %vm629_vm1 = vcmp.lt.s32.totalorder %v582_v32, 18  ;;  %vm1512_vm8 = vcmp.ge.s32.totalorder %v586_v31, 2 }
 0x351   :  { %v567_v28 = vpop.permute.xlu1 %566  ;;  %v564_v29 = vpop.permute.xlu0 %563  ;;  %vm1373_vm9 = vmand %vm1512_vm8, %vm633_vm14 }
 0x352   :  { %v583_v37 = vadd.s32 %v879_v26, %v564_v29  ;;  %v584_v43 = vadd.s32 %v879_v26, %v567_v28  ;;  %v1514_v50 = vsel %vm1373_vm9, 4294967295, %v1513_v50  ;;  %vm1377_vm13 = vmand %vm622_vm15, %vm629_vm1 }
 0x354   :  { %vm623_vm3 = vcmp.ge.s32.totalorder %v583_v37, 2  ;;  %vm630_vm4 = vcmp.lt.s32.totalorder %v583_v37, 18  ;;  %vm624_vm6 = vcmp.ge.s32.totalorder %v584_v43, 2  ;;  %vm631_vm7 = vcmp.lt.s32.totalorder %v584_v43, 18 }
 0x355   :  { %v576_v40 = vpop.permute.xlu0 %575  ;;  %vm1383_vm10 = vmand %vm623_vm3, %vm630_vm4 }
 0x356   :  { %v591_v44 = vpop.permute.xlu1 %590  ;;  %v587_v47 = vadd.s32 %v879_v26, %v576_v40  ;;  %v1518_v57 = vsel %vm1383_vm10, 4294967295, %v1517_v57  ;;  %vm1390_vm14 = vmand %vm624_vm6, %vm631_vm7  ;;  %vm1526_vm7 = vnez %v1511_v46 }
 0x357   :  { %v614_v45 = vadd.s32 %v1365_v35, %v591_v44  ;;  %v1520_v59 = vsel %vm1390_vm14, 4294967295, %v1519_v59 }
 0x358   :  { %vm627_vm11 = vcmp.ge.s32.totalorder %v587_v47, 2  ;;  %vm634_vm0 = vcmp.lt.s32.totalorder %v587_v47, 18 }
 0x359   :  { %vm642_vm5 = vcmp.ge.s32.totalorder %v614_v45, 2  ;;  %vm1404_vm6 = vmand %vm627_vm11, %vm634_vm0  ;;  %vm1529_vm11 = vnez %v1518_v57 }
 0x35a   :  { %v603_v48 = vpop.permute.xlu1 %602  ;;  %v594_v49 = vpop.permute.xlu0 %593  ;;  %vm649_vm12 = vmand %vm635_vm2, %vm642_vm5  ;;  %vm1521_vm5 = vcmp.lt.s32.totalorder %v614_v45, 18 }
 0x35b   :  { %v618_v52 = vadd.s32 %v1365_v35, %v603_v48  ;;  %v615_v53 = vadd.s32 %v1365_v35, %v594_v49  ;;  %vm1395_vm8 = vmand %vm649_vm12, %vm1521_vm5 }
 0x35c   :  { %v677_v3 = vsel %vm1395_vm8, %v670_v61, 0.0 }
 0x35d   :  { %vm646_vm15 = vcmp.ge.s32.totalorder %v618_v52, 2  ;;  %vm643_vm1 = vcmp.ge.s32.totalorder %v615_v53, 2  ;;  %vm657_vm2 = vcmp.lt.s32.totalorder %v615_v53, 18  ;;  %vm660_vm3 = vcmp.lt.s32.totalorder %v618_v52, 18 }
 0x35e   :  { %v606_v62 = vpop.permute.xlu1 %605  ;;  %v597_v63 = vpop.permute.xlu0 %596  ;;  %vm650_vm4 = vmand %vm1377_vm13, %vm643_vm1 }
 0x35f   :  { %v619_v23 = vadd.s32 %v1365_v35, %v606_v62  ;;  %v616_v0 = vadd.s32 %v1365_v35, %v597_v63  ;;  %vm664_vm12 = vmand %vm650_vm4, %vm657_vm2 }
 0x360   :  { %v678_v1 = vsel %vm664_vm12, %v671_v58, 0.0  ;;  %vm653_vm5 = vmand %vm1526_vm7, %vm646_vm15  ;;  %vm1534_vm7 = vnez %v1520_v59 }
 0x361   :  { %vm647_vm14 = vcmp.ge.s32.totalorder %v619_v23, 2  ;;  %vm644_vm9 = vcmp.ge.s32.totalorder %v616_v0, 2  ;;  %vm658_vm10 = vcmp.lt.s32.totalorder %v616_v0, 18  ;;  %vm1414_vm13 = vmand %vm653_vm5, %vm660_vm3  ;;  %vm661_vm0 = vcmp.lt.s32.totalorder %v619_v23, 18 }
 0x362   :  { %vm651_vm1 = vmand %vm1529_vm11, %vm644_vm9  ;;  %v600_v20 = vpop.permute.xlu1 %599  ;;  %v609_v2 = vpop.permute.xlu0 %608  ;;  %v684_v13 = vpack.c.bf16 %v678_v1, %v677_v3  ;;  %vm1532_vm9 = vcmask 523264   ;;  %v681_v4 = vsel %vm1414_vm13, %v674_v15, 0.0 }
 0x363   :  { %vm1426_vm15 = vmand %vm651_vm1, %vm658_vm10  ;;  %v617_v19 = vadd.s32 %v1365_v35, %v600_v20  ;;  %v620_v21 = vadd.s32 %v1365_v35, %v609_v2  ;;  %vm1533_vm10 = vnez %v1514_v50 }
 0x364   :  { %990 = vmatprep.mubr.msk.bf16.mxu0 %vm1532_vm9, %v684_v13  ;;  %vm654_vm2 = vmand %vm1533_vm10, %vm647_vm14  ;;  %v679_v12 = vsel %vm1426_vm15, %v672_v24, 0.0  ;;  %vm832_vm15 = vcmask 31744  }
 0x365   :  { %vm645_vm8 = vcmp.ge.s32.totalorder %v617_v19, 2  ;;  %vm659_vm3 = vcmp.lt.s32.totalorder %v617_v19, 18  ;;  %vm648_vm4 = vcmp.ge.s32.totalorder %v620_v21, 2  ;;  %vm668_vm12 = vmand %vm654_vm2, %vm661_vm0  ;;  %vm662_vm11 = vcmp.lt.s32.totalorder %v620_v21, 18 }
 0x366   :  { %vm652_vm5 = vmand %vm1534_vm7, %vm645_vm8  ;;  %v682_v7 = vsel %vm668_vm12, %v675_v16, 0.0 }
 0x367   :  { %vm666_vm1 = vmand %vm652_vm5, %vm659_vm3  ;;  %v686_v10 = vpack.c.bf16 %v682_v7, %v681_v4 }
 0x368   :  { %v680_v18 = vsel %vm666_vm1, %v673_v11, 0.0  ;;  %vm655_vm14 = vmand %vm1404_vm6, %vm648_vm4 }
 0x369   :  { %vm669_vm0 = vmand %vm655_vm14, %vm662_vm11  ;;  %994 = vmatprep.mubr.msk.bf16.mxu1 %vm1532_vm9, %v686_v10  ;;  %v685_v22 = vpack.c.bf16 %v680_v18, %v679_v12 }
 0x36a   :  { %v683_v34 = vsel %vm669_vm0, %v676_v8, 0.0  ;;  %vm1535_vm13 = vmmov %vm1532_vm9 }
 0x36b   :  { %991 = vmatmul.mubr.msk.bf16.vlgmr.msra.gmra.mrb[0].mxu0 %vm1535_vm13, %v685_v22  ;;  %v687_v9 = vpack.c.bf16 %v683_v34, %v683_v34  ;;  %vm1536_vm10 = vmmov %vm1532_vm9 }
 0x36d   :  { %995 = vmatmul.mubr.msk.bf16.vlgmr.msra.gmra.mrb[0].mxu1 %vm1536_vm10, %v687_v9 }
 0x43e   :  { %v992_v33 = vpop.f32.mrb[0].mxu0 }
 0x43f   :  { %v782_v25 = vadd.f32 %v992_v33, %v881_v14  ;;  %v773_v26 = vpop.f32.mrb[1].mxu0 }
 0x440   :  { %v996_v27 = vpop.f32.mrb[0].mxu1  ;;  %v774_v28 = vadd.f32 %v881_v14, %v773_v26  ;;  %v993_v29 = vpop.f32.mrb[2].mxu0 }
 0x441   :  { %vm805_vm6 = vcmp.ge.f32.partialorder %v782_v25, 0.0  ;;  %v813_v30 = vmul.f32 %v810_v36, %v782_v25  ;;  %v798_v31 = vadd.f32 %v996_v27, %v881_v14  ;;  %v789_v32 = vpop.f32.mrb[1].mxu1  ;;  %v785_v35 = vadd.f32 %v993_v29, %v881_v14  ;;  %v776_v37 = vpop.f32.mrb[3].mxu0 }
 0x442   :  { %vm803_vm2 = vcmp.ge.f32.partialorder %v774_v28, 0.0  ;;  %v811_v40 = vmul.f32 %v810_v36, %v774_v28  ;;  %v790_v43 = vadd.f32 %v881_v14, %v789_v32  ;;  %v997_v44 = vpop.f32.mrb[2].mxu1  ;;  %v777_v45 = vadd.f32 %v881_v14, %v776_v37 }
 0x443   :  { %v820_v46 = vsel %vm805_vm6, %v782_v25, %v813_v30  ;;  %vm809_vm8 = vcmp.ge.f32.partialorder %v798_v31, 0.0  ;;  %v817_v47 = vmul.f32 %v810_v36, %v798_v31  ;;  %vm806_vm3 = vcmp.ge.f32.partialorder %v785_v35, 0.0  ;;  %v792_v48 = vpop.f32.mrb[3].mxu1 }
 0x444   :  { %v827_v49 = vadd.f32 %v820_v46, %v1205_v38  ;;  %v818_v50 = vsel %vm803_vm2, %v774_v28, %v811_v40  ;;  %vm807_vm4 = vcmp.ge.f32.partialorder %v790_v43, 0.0  ;;  %v815_v51 = vmul.f32 %v810_v36, %v790_v43 }
 0x445   :  { %v824_v52 = vsel %vm809_vm8, %v798_v31, %v817_v47  ;;  %v825_v53 = vadd.f32 %v818_v50, %v1209_v41  ;;  %v814_v57 = vmul.f32 %v810_v36, %v785_v35  ;;  %vm804_vm12 = vcmp.ge.f32.partialorder %v777_v45, 0.0 }
 0x446   :  { %835 = vst.msk [vmem:[%s1508_s11 + $0x10] sm:$0xff] %vm832_vm15, %v827_v49  ;;  %v831_v58 = vadd.f32 %v824_v52, %v1217_v54  ;;  %v822_v59 = vsel %vm807_vm4, %v790_v43, %v815_v51  ;;  %v812_v60 = vmul.f32 %v810_v36, %v777_v45  ;;  %v793_v61 = vadd.f32 %v881_v14, %v792_v48 }
 0x447   :  { %833 = vst.msk [vmem:[%s1508_s11] sm:$0xff] %vm832_vm15, %v825_v53  ;;  %v829_v38 = vadd.f32 %v822_v59, %v1219_v55  ;;  %v821_v41 = vsel %vm806_vm3, %v785_v35, %v814_v57 }
 0x448   :  { %839 = vst.msk [vmem:[%s1508_s11 + $0x30] sm:$0xff] %vm832_vm15, %v831_v58  ;;  %v828_v62 = vadd.f32 %v821_v41, %v1207_v39  ;;  %v819_v54 = vsel %vm804_vm12, %v777_v45, %v812_v60  ;;  %vm808_vm7 = vcmp.ge.f32.partialorder %v793_v61, 0.0  ;;  %v816_v63 = vmul.f32 %v810_v36, %v793_v61 }
 0x449   :  { %837 = vst.msk [vmem:[%s1508_s11 + $0x20] sm:$0xff] %vm832_vm15, %v829_v38  ;;  %v826_v6 = vadd.f32 %v819_v54, %v1211_v42 }
 0x44a   :  { %836 = vst.msk [vmem:[%s1508_s11 + $0x18] sm:$0xff] %vm832_vm15, %v828_v62  ;;  %v823_v55 = vsel %vm808_vm7, %v793_v61, %v816_v63 }
 0x44b   :  { %834 = vst.msk [vmem:[%s1508_s11 + $0x8] sm:$0xff] %vm832_vm15, %v826_v6  ;;  %v830_v39 = vadd.f32 %v823_v55, %v1221_v56 }
 0x44d   :  { %838 = vst.msk [vmem:[%s1508_s11 + $0x28] sm:$0xff] %vm832_vm15, %v830_v39 }
 0x44e PF:  {}

</bundles_post_ra>
